<compile_context>
chip_gen: v7x
topology: tpu7x:2x2x1
jax: 0.10.0
libtpu: 0.0.40
codegen_flags: <defaults>
</compile_context>

<pallas_src>
import functools

import jax
import jax.numpy as jnp
from jax.experimental import pallas as pl
from jax.experimental.pallas import tpu as pltpu

_LANE = 128
_MIB = 1024 * 1024


# --------------------------------------------------------------------------
# Tiling / VMEM heuristics
# --------------------------------------------------------------------------
def _vmem_capacity_bytes():
    try:
        return int(pltpu.get_tpu_info().vmem_capacity_bytes)
    except Exception:
        return 64 * _MIB  # conservative fallback (v7x physical VMEM)


def _block_budget_bytes():
    # Bigger x/y blocks on 128 MiB chips (v5e/v6e); conservative on v7x.
    return 8 * _MIB if _vmem_capacity_bytes() >= 100 * _MIB else 4 * _MIB


def _vmem_limit_bytes(footprint_bytes):
    cap = max(int(_vmem_capacity_bytes() * 3 // 4), 32 * _MIB)
    return int(min(max(2 * footprint_bytes, 32 * _MIB), cap))


def _pad_lanes(c):
    return ((c + _LANE - 1) // _LANE) * _LANE


def _choose_tiles(B, L, Cp, itemsize, budget):
    """Pick (TILE_B, TILE_C); Cp is already a multiple of 128."""
    candidates = [d for d in range(_LANE, Cp + 1, _LANE) if Cp % d == 0]
    fitting = [d for d in candidates if L * d * itemsize <= budget]
    # TODO(synk): for very long sequences (L*128*itemsize > budget) fall back
    # to an L-tiled two-pass statistics kernel instead of one oversized block.
    tile_c = max(fitting) if fitting else _LANE

    # Keep at least 2 grid steps when possible so megacore (v7x: 2 TCs/chip)
    # has work to shard across "parallel" axes.
    if B * (Cp // tile_c) < 2:
        smaller = [d for d in (fitting or candidates) if d < Cp]
        if smaller:
            tile_c = max(smaller)

    grid_c = Cp // tile_c
    tb_cap = B if grid_c >= 2 else max(B // 2, 1)
    tile_b = 1
    while (tile_b * 2 <= tb_cap and B % (tile_b * 2) == 0
           and (tile_b * 2) * L * tile_c * itemsize <= budget):
        tile_b *= 2
    return tile_b, tile_c


# --------------------------------------------------------------------------
# Kernels
# --------------------------------------------------------------------------
def _revin_norm_kernel(x_ref, *rest, eps, affine):
    if affine:
        w_ref, b_ref, y_ref, stats_ref = rest
    else:
        y_ref, stats_ref = rest

    x = x_ref[...]                                     # (TB, L, TC)
    xf = x.astype(jnp.float32)

    # Two-pass statistics in f32 (== torch.var(unbiased=False)); `d` lives
    # only inside the variance reduction, not in the output pass.
    mean = jnp.mean(xf, axis=1, keepdims=True)         # (TB, 1, TC)
    d = xf - mean
    var = jnp.mean(d * d, axis=1, keepdims=True)
    std = jnp.sqrt(var + eps)
    inv = 1.0 / std                                    # tiny per-channel tile

    if affine:
        scale = inv * w_ref[...]                       # (TB, 1, TC)
        shift = b_ref[...] - mean * scale
    else:
        scale = inv
        shift = -mean * inv

    # Output pass depends only on x + per-channel scale/shift: one mul + add.
    if x.dtype == jnp.bfloat16:
        y = x * scale.astype(x.dtype) + shift.astype(x.dtype)
    else:
        y = xf * scale + shift
    y_ref[...] = y.astype(y_ref.dtype)

    stats_ref[:, 0:1, :] = mean.astype(stats_ref.dtype)
    stats_ref[:, 1:2, :] = std.astype(stats_ref.dtype)


def _revin_denorm_kernel(x_ref, mean_ref, std_ref, *rest, eps, affine):
    if affine:
        w_ref, b_ref, y_ref = rest
    else:
        (y_ref,) = rest

    x = x_ref[...]                                     # (TB, L, TC)
    mean = mean_ref[...]                               # (TB, 1, TC)
    std = std_ref[...]                                 # (TB, 1, TC)

    if affine:
        # y = ((x - b) / (w + eps^2)) * std + mean = x*scale + shift
        inv_w = 1.0 / (w_ref[...] + eps * eps)         # (1, 1, TC)
        scale = std * inv_w
        shift = mean - b_ref[...] * scale
    else:
        scale = std
        shift = mean

    if x.dtype == jnp.bfloat16:
        y = x * scale.astype(x.dtype) + shift.astype(x.dtype)
    else:
        y = x.astype(jnp.float32) * scale + shift
    y_ref[...] = y.astype(y_ref.dtype)


# --------------------------------------------------------------------------
# Wrappers
# --------------------------------------------------------------------------
def revin_norm(x, weight=None, bias=None, *, eps=1e-5, affine=True):
    """Returns (y, mean, stdev). x: (B, L, C); weight/bias: (C,)."""
    B, L, C = x.shape
    Cp = _pad_lanes(C)
    if Cp != C:
        x = jnp.pad(x, ((0, 0), (0, 0), (0, Cp - C)))

    itemsize = jnp.dtype(x.dtype).itemsize
    budget = _block_budget_bytes()
    tb, tc = _choose_tiles(B, L, Cp, itemsize, budget)
    grid = (B // tb, Cp // tc)

    in_specs = [pl.BlockSpec((tb, L, tc), lambda b, c: (b, 0, c))]
    args = [x]
    if affine:
        w3 = jnp.pad(weight.astype(jnp.float32), (0, Cp - C),
                     constant_values=1.0).reshape(1, 1, Cp)
        b3 = jnp.pad(bias.astype(jnp.float32), (0, Cp - C),
                     constant_values=0.0).reshape(1, 1, Cp)
        in_specs += [
            pl.BlockSpec((1, 1, tc), lambda b, c: (0, 0, c)),
            pl.BlockSpec((1, 1, tc), lambda b, c: (0, 0, c)),
        ]
        args += [w3, b3]

    out_specs = [
        pl.BlockSpec((tb, L, tc), lambda b, c: (b, 0, c)),
        pl.BlockSpec((tb, 2, tc), lambda b, c: (b, 0, c)),   # packed mean/std
    ]

    xb = tb * L * tc * itemsize
    footprint = (2 * (2 * xb + tb * 2 * tc * 4 + (2 * tc * 4 if affine else 0))
                 + 2 * tb * L * tc * 4)                       # f32 intermediates

    kernel = functools.partial(_revin_norm_kernel, eps=eps, affine=affine)
    y, stats = pl.pallas_call(
        kernel,
        out_shape=(
            jax.ShapeDtypeStruct((B, L, Cp), x.dtype),
            jax.ShapeDtypeStruct((B, 2, Cp), jnp.float32),
        ),
        grid_spec=pltpu.PrefetchScalarGridSpec(
            num_scalar_prefetch=0,
            grid=grid,
            in_specs=in_specs,
            out_specs=out_specs,
        ),
        compiler_params=pltpu.CompilerParams(
            dimension_semantics=("parallel", "parallel"),
            vmem_limit_bytes=_vmem_limit_bytes(footprint)),
    )(*args)

    mean = stats[:, 0:1, :C]
    std = stats[:, 1:2, :C]
    if Cp != C:
        y = y[:, :, :C]
    return y, mean, std


def revin_denorm(x, mean, std, weight=None, bias=None, *, eps=1e-5,
                 affine=True):
    """Inverse transform. x: (B, L, C); mean/std: (B, 1, C)."""
    B, L, C = x.shape
    Cp = _pad_lanes(C)
    mean = mean.astype(jnp.float32)
    std = std.astype(jnp.float32)
    if Cp != C:
        pad3 = ((0, 0), (0, 0), (0, Cp - C))
        x = jnp.pad(x, pad3)
        mean = jnp.pad(mean, pad3)
        std = jnp.pad(std, pad3)

    itemsize = jnp.dtype(x.dtype).itemsize
    budget = _block_budget_bytes()
    tb, tc = _choose_tiles(B, L, Cp, itemsize, budget)
    grid = (B // tb, Cp // tc)

    in_specs = [
        pl.BlockSpec((tb, L, tc), lambda b, c: (b, 0, c)),
        pl.BlockSpec((tb, 1, tc), lambda b, c: (b, 0, c)),
        pl.BlockSpec((tb, 1, tc), lambda b, c: (b, 0, c)),
    ]
    args = [x, mean, std]
    if affine:
        w3 = jnp.pad(weight.astype(jnp.float32), (0, Cp - C),
                     constant_values=1.0).reshape(1, 1, Cp)
        b3 = jnp.pad(bias.astype(jnp.float32), (0, Cp - C),
                     constant_values=0.0).reshape(1, 1, Cp)
        in_specs += [
            pl.BlockSpec((1, 1, tc), lambda b, c: (0, 0, c)),
            pl.BlockSpec((1, 1, tc), lambda b, c: (0, 0, c)),
        ]
        args += [w3, b3]

    xb = tb * L * tc * itemsize
    footprint = (2 * (2 * xb + 2 * tb * tc * 4 + (2 * tc * 4 if affine else 0))
                 + tb * L * tc * 4)

    kernel = functools.partial(_revin_denorm_kernel, eps=eps, affine=affine)
    y = pl.pallas_call(
        kernel,
        out_shape=jax.ShapeDtypeStruct((B, L, Cp), x.dtype),
        grid_spec=pltpu.PrefetchScalarGridSpec(
            num_scalar_prefetch=0,
            grid=grid,
            in_specs=in_specs,
            out_specs=pl.BlockSpec((tb, L, tc), lambda b, c: (b, 0, c)),
        ),
        compiler_params=pltpu.CompilerParams(
            dimension_semantics=("parallel", "parallel"),
            vmem_limit_bytes=_vmem_limit_bytes(footprint)),
    )(*args)
    if Cp != C:
        y = y[:, :, :C]
    return y


# --------------------------------------------------------------------------
# Pure-JAX reference (mirrors the PyTorch module exactly)
# --------------------------------------------------------------------------
def _ref_norm(x, weight, bias, eps, affine):
    mean = jnp.mean(x, axis=1, keepdims=True)
    std = jnp.sqrt(jnp.var(x, axis=1, keepdims=True, ddof=0) + eps)
    y = (x - mean) / std
    if affine:
        y = y * weight + bias
    return y, mean, std


def _ref_denorm(x, mean, std, weight, bias, eps, affine):
    if affine:
        x = x - bias
        x = x / (weight + eps * eps)
    return x * std + mean


# --------------------------------------------------------------------------
if __name__ == "__main__":
    key = jax.random.PRNGKey(0)
    B, L, C = 2, 8, 32          # batch, seq length, num_features
    eps = 1e-5
    affine = True

    x = jax.random.normal(key, (B, L, C), dtype=jnp.float32) * 3.0 + 1.5

    # Same init as nn.Parameter(torch.ones/zeros(num_features))
    affine_weight = jnp.ones((C,), dtype=jnp.float32)
    affine_bias = jnp.zeros((C,), dtype=jnp.float32)

    # mode == 'norm'
    y, mean, std = revin_norm(x, affine_weight, affine_bias,
                              eps=eps, affine=affine)
    jax.block_until_ready(y)

    # mode == 'denorm' (round-trip)
    x_rec = revin_denorm(y, mean, std, affine_weight, affine_bias,
                         eps=eps, affine=affine)
    jax.block_until_ready(x_rec)

    # Correctness check against the pure-JAX reference
    y_ref, mean_ref, std_ref = _ref_norm(x, affine_weight, affine_bias,
                                         eps, affine)
    x_rec_ref = _ref_denorm(y_ref, mean_ref, std_ref, affine_weight,
                            affine_bias, eps, affine)

    assert jnp.allclose(y, y_ref, atol=1e-5, rtol=1e-5)
    assert jnp.allclose(mean, mean_ref, atol=1e-5, rtol=1e-5)
    assert jnp.allclose(std, std_ref, atol=1e-5, rtol=1e-5)
    assert jnp.allclose(x_rec, x_rec_ref, atol=1e-5, rtol=1e-5)
    assert jnp.allclose(x_rec, x, atol=1e-3, rtol=1e-3)

    # Also exercise the affine=False path.
    y2, mean2, std2 = revin_norm(x, eps=eps, affine=False)
    x_rec2 = revin_denorm(y2, mean2, std2, eps=eps, affine=False)
    jax.block_until_ready(x_rec2)
    assert jnp.allclose(x_rec2, x, atol=1e-3, rtol=1e-3)

    print("KERNEL_OK")
</pallas_src>

<mosaic_0001>
module attributes {stable_mosaic.version = 11 : i64} {
  func.func @_revin_norm_kernel(%arg0: i32, %arg1: i32, %arg2: memref<1x8x128xf32, #tpu.memory_space<vmem>>, %arg3: memref<1x1x128xf32, #tpu.memory_space<vmem>>, %arg4: memref<1x1x128xf32, #tpu.memory_space<vmem>>, %arg5: memref<1x8x128xf32, #tpu.memory_space<vmem>>, %arg6: memref<1x2x128xf32, #tpu.memory_space<vmem>>) attributes {dimension_semantics = [#tpu.dimension_semantics<parallel>, #tpu.dimension_semantics<parallel>], iteration_bounds = array<i64: 2, 1>, scalar_prefetch = 0 : i64, scratch_operands = 0 : i64, tpu.core_type = #tpu.core_type<tc>, window_params = [{transform_indices = @transform_0, window_bounds = array<i64: 1, 8, 128>}, {transform_indices = @transform_1, window_bounds = array<i64: 1, 1, 128>}, {transform_indices = @transform_2, window_bounds = array<i64: 1, 1, 128>}, {transform_indices = @transform_3, window_bounds = array<i64: 1, 8, 128>}, {transform_indices = @transform_4, window_bounds = array<i64: 1, 2, 128>}]} {
    %c0 = arith.constant 0 : index
    %c0_0 = arith.constant 0 : index
    %c0_1 = arith.constant 0 : index
    %0 = vector.load %arg2[%c0, %c0_0, %c0_1] : memref<1x8x128xf32, #tpu.memory_space<vmem>>, vector<1x8x128xf32>
    %cst = arith.constant dense<0.000000e+00> : vector<1x128xf32>
    %1 = vector.multi_reduction <add>, %0, %cst [1] : vector<1x8x128xf32> to vector<1x128xf32>
    %2 = vector.shape_cast %1 : vector<1x128xf32> to vector<1x1x128xf32>
    %cst_2 = arith.constant 8.000000e+00 : f32
    %3 = vector.broadcast %cst_2 : f32 to vector<1x1x128xf32>
    %4 = arith.divf %2, %3 : vector<1x1x128xf32>
    %5 = vector.broadcast %4 : vector<1x1x128xf32> to vector<1x8x128xf32>
    %6 = arith.subf %0, %5 : vector<1x8x128xf32>
    %7 = arith.mulf %6, %6 : vector<1x8x128xf32>
    %cst_3 = arith.constant dense<0.000000e+00> : vector<1x128xf32>
    %8 = vector.multi_reduction <add>, %7, %cst_3 [1] : vector<1x8x128xf32> to vector<1x128xf32>
    %9 = vector.shape_cast %8 : vector<1x128xf32> to vector<1x1x128xf32>
    %cst_4 = arith.constant 8.000000e+00 : f32
    %10 = vector.broadcast %cst_4 : f32 to vector<1x1x128xf32>
    %11 = arith.divf %9, %10 : vector<1x1x128xf32>
    %cst_5 = arith.constant 9.99999974E-6 : f32
    %12 = vector.broadcast %cst_5 : f32 to vector<1x1x128xf32>
    %13 = arith.addf %11, %12 : vector<1x1x128xf32>
    %14 = math.sqrt %13 : vector<1x1x128xf32>
    %cst_6 = arith.constant 1.000000e+00 : f32
    %15 = vector.broadcast %cst_6 : f32 to vector<1x1x128xf32>
    %16 = arith.divf %15, %14 : vector<1x1x128xf32>
    %c0_7 = arith.constant 0 : index
    %c0_8 = arith.constant 0 : index
    %c0_9 = arith.constant 0 : index
    %17 = vector.load %arg3[%c0_7, %c0_8, %c0_9] : memref<1x1x128xf32, #tpu.memory_space<vmem>>, vector<1x1x128xf32>
    %18 = arith.mulf %16, %17 : vector<1x1x128xf32>
    %c0_10 = arith.constant 0 : index
    %c0_11 = arith.constant 0 : index
    %c0_12 = arith.constant 0 : index
    %19 = vector.load %arg4[%c0_10, %c0_11, %c0_12] : memref<1x1x128xf32, #tpu.memory_space<vmem>>, vector<1x1x128xf32>
    %20 = arith.mulf %4, %18 : vector<1x1x128xf32>
    %21 = arith.subf %19, %20 : vector<1x1x128xf32>
    %22 = vector.broadcast %18 : vector<1x1x128xf32> to vector<1x8x128xf32>
    %23 = arith.mulf %0, %22 : vector<1x8x128xf32>
    %24 = vector.broadcast %21 : vector<1x1x128xf32> to vector<1x8x128xf32>
    %25 = arith.addf %23, %24 : vector<1x8x128xf32>
    %c0_13 = arith.constant 0 : index
    %c0_14 = arith.constant 0 : index
    %c0_15 = arith.constant 0 : index
    %26 = vector.load %arg5[%c0_13, %c0_14, %c0_15] : memref<1x8x128xf32, #tpu.memory_space<vmem>>, vector<1x8x128xf32>
    tpu.vector_store %arg5[%c0_13, %c0_14, %c0_15], %25 {strides = array<i32>} : memref<1x8x128xf32, #tpu.memory_space<vmem>>, vector<1x8x128xf32>,
    %c0_16 = arith.constant 0 : index
    %c0_17 = arith.constant 0 : index
    %c0_18 = arith.constant 0 : index
    %27 = vector.load %arg6[%c0_16, %c0_17, %c0_18] : memref<1x2x128xf32, #tpu.memory_space<vmem>>, vector<1x1x128xf32>
    tpu.vector_store %arg6[%c0_16, %c0_17, %c0_18], %4 {strides = array<i32>} : memref<1x2x128xf32, #tpu.memory_space<vmem>>, vector<1x1x128xf32>,
    %c0_19 = arith.constant 0 : index
    %c1 = arith.constant 1 : index
    %c0_20 = arith.constant 0 : index
    %28 = vector.load %arg6[%c0_19, %c1, %c0_20] : memref<1x2x128xf32, #tpu.memory_space<vmem>>, vector<1x1x128xf32>
    tpu.vector_store %arg6[%c0_19, %c1, %c0_20], %14 {strides = array<i32>} : memref<1x2x128xf32, #tpu.memory_space<vmem>>, vector<1x1x128xf32>,
    return
  }
  func.func @transform_0(%arg0: i32, %arg1: i32) -> (i32, i32, i32) {
    %c0_i32 = arith.constant 0 : i32
    %c0_i32_0 = arith.constant 0 : i32
    return %arg0, %c0_i32, %arg1 : i32, i32, i32
  }
  func.func @transform_1(%arg0: i32, %arg1: i32) -> (i32, i32, i32) {
    %c0_i32 = arith.constant 0 : i32
    %c0_i32_0 = arith.constant 0 : i32
    %c0_i32_1 = arith.constant 0 : i32
    return %c0_i32, %c0_i32_0, %arg1 : i32, i32, i32
  }
  func.func @transform_2(%arg0: i32, %arg1: i32) -> (i32, i32, i32) {
    %c0_i32 = arith.constant 0 : i32
    %c0_i32_0 = arith.constant 0 : i32
    %c0_i32_1 = arith.constant 0 : i32
    return %c0_i32, %c0_i32_0, %arg1 : i32, i32, i32
  }
  func.func @transform_3(%arg0: i32, %arg1: i32) -> (i32, i32, i32) {
    %c0_i32 = arith.constant 0 : i32
    %c0_i32_0 = arith.constant 0 : i32
    return %arg0, %c0_i32, %arg1 : i32, i32, i32
  }
  func.func @transform_4(%arg0: i32, %arg1: i32) -> (i32, i32, i32) {
    %c0_i32 = arith.constant 0 : i32
    %c0_i32_0 = arith.constant 0 : i32
    return %arg0, %c0_i32, %arg1 : i32, i32, i32
  }
}

</mosaic_0001>

<bundles_post_ra>
// kernel: tpu_custom_call.1
= control target key start
LH: loop header
LB: loop body
LE: loop exit
PB: predicated region body
PF: predicated region fallthrough
CT: control target
= control target key end

     0   :  { %10 = vsyncpa [#allocation3], 0  ;;  %s972_s0 = inlined_call_operand.hbm [shape: f32[2,8,128], index: 0, kind: input, shape index: {}]   ;;  %s973_s1 = inlined_call_operand.vmem [shape: f32[1,1,128], index: 1, kind: input, shape index: {}]   ;;  %s974_s2 = inlined_call_operand.vmem [shape: f32[1,1,128], index: 2, kind: input, shape index: {}]   ;;  %s975_s3 = inlined_call_operand.hbm [shape: f32[2,8,128], index: 3, kind: output, shape index: {0}]   ;;  %s976_s4 = inlined_call_operand.hbm [shape: f32[2,2,128], index: 4, kind: output, shape index: {1}]  }
   0x1   :  { %12 = vsyncpa [#allocation3 + $0x1], 0 }
   0x2   :  { %13 = vsyncpa [#allocation4], 0 }
   0x3   :  { %15 = vsyncpa [#allocation4 + $0x1], 0 }
   0x4   :  { %16 = vsyncpa [#allocation7], 0 }
   0x5   :  { %18 = vsyncpa [#allocation7 + $0x1], 0  ;;  %s753_s15 = smov 0   ;;  %s755_s16 = smov 0  }
   0x6   :  { %s757_s17 = smov 0   ;;  %s759_s18 = smov 0  }
   0x7   :  { %s761_s19 = smov 0   ;;  %s763_s20 = smov 0  }
   0x8 LB: > { %s490_s21 = sadd.s32 4294967295, %s723_s20   ;;  %s491_s22 = sadd.s32 4294967294, %s723_s20   ;;  %s723_s20 = sphi %s763_s20, %s24_s20   ;;  %s719_s19 = sphi %s761_s19, %s992_s19   ;;  %s715_s18 = sphi %s759_s18, %s991_s18   ;;  %s711_s17 = sphi %s757_s17, %s990_s17   ;;  %s707_s16 = sphi %s755_s16, %s989_s16   ;;  %s703_s15 = sphi %s753_s15, %s988_s15  }
   0x9   : > { %s36_s23 = sadd.s32 1, %s719_s19  ;;  %s45_s24 = sadd.s32 1, %s711_s17 }
   0xa   : > { %p38_p0 = scmp.ge.s32.totalorder %s36_s23, 2  ;;  %p52_p1 = scmp.ne.s32.totalorder %s711_s17, %s707_s16 }
   0xb   : > { %p53_p2 = scmp.eq.s32.totalorder %s723_s20, 0  ;;  %p58_p3 = scmp.ne.s32.totalorder %s707_s16, %s703_s15 }
   0xc   : > { %s994_s23 = smov (%p38_p0, %s36_s23), 0  ;;  %p59_p5 = scmp.eq.s32.totalorder %s490_s21, 0 }
   0xd   : > { %p794_p4 = por %p53_p2, %p52_p1  ;;  %s40_s26 = ssub.s32 %s719_s19, %s994_s23 }
   0xe   : > { %p136_p6 = scmp.eq.s32.totalorder %s490_s21, 1  ;;  %p43_p7 = scmp.eq.s32.totalorder %s40_s26, 0 }
   0xf   : > { %p800_p8 = por %p59_p5, %p58_p3  ;;  %p142_p10 = scmp.eq.s32.totalorder %s491_s22, 1 }
  0x10   : > { %p804_p9 = por %p136_p6, %p52_p1  ;;  %p525_p13 = scmp.lt.s32.totalorder %s723_s20, 2 }
  0x11   : > { %s809_s29 = scalar_select %p43_p7, %s711_s17, %s45_s24  }
  0x12   : > { %s980_s28 = scalar_select %p804_p9, 1, 0 }
  0x13   : > { %p811_p11 = por %p142_p10, %p58_p3  ;;  %s202_s5 = sand.u32 1, %s711_s17  }
  0x14   : > { %s496_s6 = sshll.u32 %s202_s5, 3  ;;  %s497_s7 = sshll.u32 %s719_s19, 7 }
  0x15   : > { %s981_s30 = scalar_select %p811_p11, 1, 0 }
  0x16   : > { %s822_s10 = scalar_lea.hbm %s972_s0, %s497_s7  ;;  %s206_s11 = scalar_lea.vmem [#allocation2], %s496_s6 }
  0x17   : > { %s214_s12 = sshll.u32 %s206_s11, 4  ;;  %p828_p0 = pnand %p525_p13, %p794_p4  ;;  %s824_s12 = int_to_ptr.vmem [resolvable:$true] %s214_s12 }
  0x18   : > { %s203_s14 = scalar_lea.sflag [#allocation3], %s202_s5  ;;  %s579_s21 = scalar_lea.hbm %s822_s10, 128 }
  0x19   : > { %p580_p3 = scmp.ne.s32.totalorder %s822_s10, %s579_s21  ;;  %p581_p5 = pneg %p828_p0 }
  0x1a   : > { %s584_s25 = scalar_lea.hbm %s972_s0, 256  ;;  %p585_p4 = scmp.lt.u32.totalorder %s822_s10, %s972_s0 }
  0x1b   : > { %p582_p6 = pnand %p581_p5, %p580_p3  ;;  %p586_p10 = scmp.lt.u32.totalorder %s584_s25, %s579_s21 }
  0x1c   : > { %p588_p12 = scmp.lt.u32.totalorder %s579_s21, %s822_s10 }
  0x1d   : > { %p583_p7 = pneg %p582_p6  ;;  %p587_p13 = por %p586_p10, %p585_p4 }
  0x1f   : > { %p589_p1 = por %p588_p12, %p587_p13 }
  0x21   : > { %p590_p2 = pnand %p589_p1, %p583_p7 }
  0x23   : > { %593 = shalt.err (!%p590_p2)
}
  0x24   : > { %s594_s5 = scalar_lea.vmem %s824_s12, 128  ;;  %s725_s7 = smov [#allocation2]  }
  0x25   : > { %p595_p3 = scmp.ne.s32.totalorder %s824_s12, %s594_s5  ;;  %s599_s8 = sshll.u32 %s725_s7, 4  ;;  %s600_s8 = int_to_ptr.vmem [resolvable:$false] %s599_s8 }
  0x26   : > { %s601_s9 = scalar_lea.vmem %s600_s8, 256  ;;  %p602_p9 = scmp.lt.s32.totalorder %s824_s12, %s600_s8 }
  0x27   : > { %p597_p6 = pnand %p595_p3, %p581_p5  ;;  %p603_p4 = scmp.lt.s32.totalorder %s601_s9, %s594_s5 }
  0x29   : > { %p598_p11 = pneg %p597_p6  ;;  %p604_p10 = por %p603_p4, %p602_p9 }
  0x2b   : > { %p605_p12 = pnand %p604_p10, %p598_p11 }
  0x2d   : > { %608 = shalt.err (!%p605_p12)
}
  0x2e   : > { %517 = dma.hbm_to_vmem [thread:$0]  (!%p828_p0), %s822_s10, 128, %s824_s12, %s203_s14  }
  0x2f   : > { %p983_p1 = scmp.lt.s32.totalorder %s723_s20, 3  ;;  %p984_p2 = scmp.ge.s32.totalorder %s723_s20, 1 }
  0x31   : > { %p220_p5 = pnand %p984_p2, %p983_p1 }
  0x32   : > { %s864_s11 = sand.u32 (!%p220_p5), 1, %s707_s16  }
  0x33   : > { %223 = sbr.rel (%p220_p5) target bundleno = 148 (0x94), region = 32  ;;  %s499_s21 = sshll.u32 (!%p220_p5), %s864_s11, 3 }
  0x34   : > { %s226_s22 = scalar_lea.sflag (!%p220_p5), [#allocation3], %s864_s11  ;;  %s229_s13 = scalar_lea.vmem (!%p220_p5), [#allocation2], %s499_s21 }
  0x3a   : > { %690 = dma.done.wait (%p800_p8), %s226_s22, 128  }
  0x3b   : > { %692 = vsyncadd (%p800_p8), %s226_s22, 4294967168  ;;  %v874_v0 = vld [vmem:[%s229_s13] sm:$0xff]  ;;  %s501_s10 = sshll.u32 %s864_s11, 1  ;;  %s505_s14 = sshll.u32 %s715_s18, 5  ;;  %v304_v23 = vlaneseq }
  0x3c   : > { %v272_v1 = vrot.slane %v874_v0, 4  ;;  %s264_s12 = scalar_lea.vmem [#allocation6], %s501_s10  ;;  %s886_s26 = scalar_lea.hbm %s976_s4, %s505_s14 }
  0x3d   : > { %s353_s27 = sshll.u32 %s264_s12, 4  ;;  %s325_s6 = scalar_lea.sflag [#allocation7], %s864_s11  ;;  %s881_s27 = int_to_ptr.vmem [resolvable:$true] %s353_s27 }
  0x3e   : > { %v273_v2 = vadd.f32 %v272_v1, %v874_v0  ;;  %s609_s5 = scalar_lea.vmem %s881_s27, 32  ;;  %p985_p9 = scmp.ne.s32.totalorder %s980_s28, 0 }
  0x3f   : > { %p610_p8 = scmp.ne.s32.totalorder %s881_s27, %s609_s5  ;;  %s726_s7 = smov [#allocation6]  }
  0x40   : > { %v274_v3 = vrot.slane %v273_v2, 2  ;;  %s613_s8 = sshll.u32 %s726_s7, 4  ;;  %s614_s8 = int_to_ptr.vmem [resolvable:$false] %s613_s8 }
  0x41   : > { %p611_p11 = pnand %p610_p8, %p985_p9  ;;  %s615_s9 = scalar_lea.vmem %s614_s8, 64 }
  0x42   : > { %v275_v4 = vadd.f32 %v274_v3, %v273_v2  ;;  %p616_p7 = scmp.lt.s32.totalorder %s881_s27, %s614_s8  ;;  %p617_p13 = scmp.lt.s32.totalorder %s615_s9, %s609_s5 }
  0x43   : > { %p612_p0 = pneg %p611_p11 }
  0x44   : > { %v276_v5 = vrot.slane %v275_v4, 1  ;;  %p618_p3 = por %p617_p13, %p616_p7 }
  0x46   : > { %v277_v6 = vadd.f32 %v276_v5, %v275_v4  ;;  %p619_p6 = pnand %p618_p3, %p612_p0 }
  0x48   : > { %v279_v7 = vmul.f32 0.125, %v277_v6 }
  0x4a   : > { %v280_v8 = vsub.f32 %v874_v0, %v279_v7  ;;  %317 = vst [vmem:[%s264_s12] sm:$0x1] %v279_v7 }
  0x4c   : > { %v281_v9 = vmul.f32 %v280_v8, %v280_v8 }
  0x4e   : > { %v282_v10 = vrot.slane %v281_v9, 4 }
  0x50   : > { %v283_v11 = vadd.f32 %v282_v10, %v281_v9 }
  0x52   : > { %v284_v12 = vrot.slane %v283_v11, 2 }
  0x54   : > { %v285_v13 = vadd.f32 %v284_v12, %v283_v11 }
  0x56   : > { %v286_v14 = vrot.slane %v285_v13, 1 }
  0x58   : > { %v287_v15 = vadd.f32 %v286_v14, %v285_v13 }
  0x5a   : > { %v288_v16 = vmul.f32 0.125, %v287_v15 }
  0x5c   : > { %v289_v17 = vadd.f32 1e-05, %v288_v16 }
  0x5e   : > { %575 = vrsqrt.f32 %v289_v17  ;;  %vm292_vm0 = vcmp.eq.f32.partialorder %v289_v17, inf  ;;  %v295_v19 = vand.u32 2147483648, %v289_v17  ;;  %vm294_vm1 = vcmp.eq.f32.partialorder %v289_v17, 0.0 }
  0x68   : > { %v576_v18 = vpop.eup %575 }
  0x69   : > { %v291_v20 = vmul.f32 %v576_v18, %v289_v17 }
  0x6b   : > { %v293_v21 = vsel %vm292_vm0, %v289_v17, %v291_v20 }
  0x6c   : > { %v296_v22 = vsel %vm294_vm1, %v295_v19, %v293_v21 }
  0x6d   : > { %577 = vrcp.f32 %v296_v22  ;;  %318 = vst [vmem:[%s264_s12 + $0x1] sm:$0x1] %v296_v22 }
  0x6e   : > { %622 = shalt.err (!%p619_p6)
}
  0x6f   : > { %s623_s22 = scalar_lea.hbm %s886_s26, 32  ;;  %s627_s12 = scalar_lea.hbm %s976_s4, 64 }
  0x70   : > { %p624_p4 = scmp.ne.s32.totalorder %s886_s26, %s623_s22  ;;  %p628_p1 = scmp.lt.u32.totalorder %s886_s26, %s976_s4 }
  0x71   : > { %p629_p2 = scmp.lt.u32.totalorder %s627_s12, %s623_s22  ;;  %p631_p8 = scmp.lt.u32.totalorder %s623_s22, %s886_s26 }
  0x72   : > { %p625_p10 = pnand %p624_p4, %p985_p9 }
  0x73   : > { %p630_p5 = por %p629_p2, %p628_p1 }
  0x74   : > { %p626_p12 = pneg %p625_p10 }
  0x75   : > { %p632_p11 = por %p631_p8, %p630_p5 }
  0x77   : > { %p633_p0 = pnand %p632_p11, %p626_p12 }
  0x79   : > { %636 = shalt.err (!%p633_p0)
}
  0x7a   : > { %511 = dma.vmem_to_hbm [thread:$0]  (%p985_p9), %s881_s27, 32, %s886_s26, %s325_s6   ;;  %v305_v24 = vshrl.u32 %v304_v23, 7  ;;  %v299_v25 = vld [vmem:[%s973_s1] sm:$0x1]  ;;  %v578_v27 = vpop.eup %577 }
  0x7b   : > { %v300_v28 = vmul.f32 %v578_v27, %v299_v25  ;;  %v301_v29 = vld [vmem:[%s974_s2] sm:$0x1]  ;;  %s257_s27 = scalar_lea.vmem [#allocation5], %s499_s21  ;;  %s504_s6 = sshll.u32 %s715_s18, 7 }
  0x7c   : > { %v306_v26 = vsub.s32 0, %v305_v24  ;;  %s339_s26 = sshll.u32 %s257_s27, 4  ;;  %s925_s13 = scalar_lea.hbm %s975_s3, %s504_s6  ;;  %s920_s26 = int_to_ptr.vmem [resolvable:$true] %s339_s26 }
  0x7d   : > { %v302_v30 = vmul.f32 %v300_v28, %v279_v7  ;;  %s320_s10 = scalar_lea.sflag [#allocation4], %s864_s11  ;;  %s637_s12 = scalar_lea.vmem %s920_s26, 128 }
  0x7e   : > { %v307_v31 = vrot.slane %v300_v28, %v306_v26  ;;  %p638_p7 = scmp.ne.s32.totalorder %s920_s26, %s637_s12  ;;  %s727_s18 = smov [#allocation5]  }
  0x7f   : > { %v303_v32 = vsub.f32 %v301_v29, %v302_v30  ;;  %s641_s21 = sshll.u32 %s727_s18, 4  ;;  %s642_s21 = int_to_ptr.vmem [resolvable:$false] %s641_s21 }
  0x80   : > { %v308_v33 = vmul.f32 %v307_v31, %v874_v0  ;;  %p639_p13 = pnand %p638_p7, %p985_p9  ;;  %s643_s14 = scalar_lea.vmem %s642_s21, 256 }
  0x81   : > { %v313_v34 = vrot.slane %v303_v32, %v306_v26  ;;  %p644_p6 = scmp.lt.s32.totalorder %s920_s26, %s642_s21  ;;  %p645_p4 = scmp.lt.s32.totalorder %s643_s14, %s637_s12 }
  0x82   : > { %p640_p3 = pneg %p639_p13 }
  0x83   : > { %v315_v35 = vadd.f32 %v313_v34, %v308_v33  ;;  %p646_p10 = por %p645_p4, %p644_p6 }
  0x85   : > { %316 = vst [vmem:[%s257_s27] sm:$0xff] %v315_v35  ;;  %p647_p12 = pnand %p646_p10, %p640_p3 }
  0x87   : > { %650 = shalt.err (!%p647_p12)
}
  0x88   : > { %s651_s11 = scalar_lea.hbm %s925_s13, 128  ;;  %s655_s5 = scalar_lea.hbm %s975_s3, 256 }
  0x89   : > { %p652_p1 = scmp.ne.s32.totalorder %s925_s13, %s651_s11  ;;  %p656_p8 = scmp.lt.u32.totalorder %s925_s13, %s975_s3 }
  0x8a   : > { %p657_p11 = scmp.lt.u32.totalorder %s655_s5, %s651_s11  ;;  %p659_p7 = scmp.lt.u32.totalorder %s651_s11, %s925_s13 }
  0x8b   : > { %p653_p2 = pnand %p652_p1, %p985_p9 }
  0x8c   : > { %p658_p0 = por %p657_p11, %p656_p8 }
  0x8d   : > { %p654_p5 = pneg %p653_p2 }
  0x8e   : > { %p660_p13 = por %p659_p7, %p658_p0 }
  0x90   : > { %p661_p3 = pnand %p660_p13, %p654_p5 }
  0x92   : > { %664 = shalt.err (!%p661_p3)
}
  0x93   : > { %510 = dma.vmem_to_hbm [thread:$0]  (%p985_p9), %s920_s26, 128, %s925_s13, %s320_s10  }
  0x94 PF: > { %s365_s27 = sand.u32 1, %s703_s15   ;;  %p986_p6 = scmp.ne.s32.totalorder %s981_s30, 0 }
  0x95   : > { %p987_p4 = scmp.ge.s32.totalorder %s723_s20, 2  ;;  %s366_s6 = scalar_lea.sflag [#allocation4], %s365_s27 }
  0x97   : > { %p519_p10 = pnand %p987_p4, %p986_p6 }
  0x99   : > { %694 = dma.done.wait (!%p519_p10), %s366_s6, 128  }
  0x9a   : > { %696 = vsyncadd (!%p519_p10), %s366_s6, 4294967168  ;;  %s375_s9 = scalar_lea.sflag [#allocation7], %s365_s27 }
  0x9b   : > { %698 = dma.done.wait (!%p519_p10), %s375_s9, 32  }
  0x9c   : > { %700 = vsyncadd (!%p519_p10), %s375_s9, 4294967264  ;;  %s24_s20 = sadd.s32 1, %s723_s20   ;;  %s988_s15 = smov %s707_s16 }
  0x9d   : > { %p21_p12 = scmp.ge.s32.totalorder %s24_s20, 4   ;;  %s989_s16 = smov %s711_s17 }
  0x9e   : > { %s990_s17 = smov %s809_s29  ;;  %s991_s18 = smov %s719_s19 }
  0x9f   : > { %s992_s19 = smov %s994_s23  ;;  %23 = sbr.rel (!%p21_p12) target bundleno = 8 (0x8), region = 100 }
  0xa6   :  { %380 = vsyncpa [#allocation3], 1 }
  0xa7   :  { %382 = vsyncpa [#allocation3 + $0x1], 1 }
  0xa8   :  { %383 = vsyncpa [#allocation4], 1 }
  0xa9   :  { %385 = vsyncpa [#allocation4 + $0x1], 1 }
  0xaa   :  { %386 = vsyncpa [#allocation7], 1 }
  0xab   :  { %388 = vsyncpa [#allocation7 + $0x1], 1 }

</bundles_post_ra>
